<compile_context>
chip_gen: v7x
topology: tpu7x:2x2x1
jax: 0.10.0
libtpu: 0.0.40
codegen_flags: <defaults>
</compile_context>

<pallas_src>
import functools

import jax
import jax.numpy as jnp
from jax.experimental import pallas as pl
from jax.experimental.pallas import tpu as pltpu

_LANE = 128


def _round_up(x, m):
    return ((x + m - 1) // m) * m


def fused_graph_model_kernel(inv_n, a_ref, x_ref, w_ref, gamma_ref, beta_ref,
                             p_ref, wfc_ref, bfc_ref, out_ref, h_ref):
    """One grid step == one GCN layer (layer axis streams W / gamma / beta).

    Resident across the layer axis (index_map returns the same block):
      a_ref:   [Np, Np]  bf16  normalized adjacency A_hat, zero-padded
      x_ref:   [Np, Fp]  bf16  node features (consumed only at layer 0)
      p_ref:   [G,  Np]  bf16  mean-pool matrix (zero cols on padded nodes)
      wfc_ref: [Fp, Ffc] bf16  post-FC weight
      bfc_ref: [1,  Ffc] f32   post-FC bias
      out_ref: [G,  Ffc] f32   written only on the last layer
      h_ref:   [Np, Fp]  bf16  VMEM scratch carrying activations across layers
    Streamed per layer (double-buffered by the Pallas pipeline):
      w_ref:     [1, Fp, Fp] bf16
      gamma_ref: [1, 1, Fp]  f32
      beta_ref:  [1, 1, Fp]  f32
    """
    layer = pl.program_id(0)

    @pl.when(layer == 0)
    def _():
        h_ref[...] = x_ref[...]

    # GCN layer: A_hat @ (H @ W).  XW first keeps the N^2 matmul on the output
    # width.  The GCNConv bias is omitted on purpose: a per-feature constant
    # added before training-mode BatchNorm is cancelled by the mean subtraction.
    xw = jnp.dot(h_ref[...], w_ref[0], preferred_element_type=jnp.float32)
    agg = jnp.dot(a_ref[...], xw.astype(jnp.bfloat16),
                  preferred_element_type=jnp.float32)

    # BatchNorm1d (training-mode batch stats over the TRUE node count).
    # Padded node rows of `agg` are exactly zero (A_hat has zero rows there),
    # so summing over the padded array and scaling by inv_n = 1/true_N is exact.
    s1 = jnp.sum(agg, axis=0, keepdims=True)
    s2 = jnp.sum(agg * agg, axis=0, keepdims=True)
    mean = s1 * inv_n
    var = jnp.maximum(s2 * inv_n - mean * mean, 0.0)   # biased var (PyTorch fwd)
    inv_std = jax.lax.rsqrt(var + 1e-5)                # EUP slot, ~free
    scale = gamma_ref[0] * inv_std                     # [1, Fp]
    shift = beta_ref[0] - mean * scale
    h_new = jnp.maximum(agg * scale + shift, 0.0).astype(jnp.bfloat16)  # BN+ReLU
    h_ref[...] = h_new

    @pl.when(layer == pl.num_programs(0) - 1)
    def _():
        # GraphPool('mean') as a dense pooling matmul, then post-FC Linear+ReLU
        # (use_bn=False branch; Dropout = identity).
        pooled = jnp.dot(p_ref[...], h_new, preferred_element_type=jnp.float32)
        fc = jnp.dot(pooled.astype(jnp.bfloat16), wfc_ref[...],
                     preferred_element_type=jnp.float32) + bfc_ref[...]
        out_ref[...] = jnp.maximum(fc, 0.0).astype(out_ref.dtype)


def _vmem_limit_bytes(footprint_bytes):
    """Footprint-derived VMEM limit with headroom, capped per generation."""
    try:
        cap = int(pltpu.get_tpu_info().vmem_capacity_bytes)
    except Exception:  # pragma: no cover - conservative fallback (v7x per-TC)
        cap = 64 * 1024 * 1024
    want = int(footprint_bytes * 1.5) + (8 << 20)   # compiler-internal headroom
    return max(32 << 20, min(want, int(cap * 0.9)))


def graph_model_forward(a_hat, x, w_stack, gamma, beta, pool_mat, w_fc, b_fc,
                        *, n_true):
    n_pad = a_hat.shape[0]
    num_layers, f_pad, _ = w_stack.shape
    g = pool_mat.shape[0]
    f_fc = w_fc.shape[1]

    # bf16 at the kernel boundary (halves DMA bytes, native MXU dtype);
    # accumulation and the BN/ReLU epilogue stay in f32 inside the kernel.
    a16 = a_hat.astype(jnp.bfloat16)
    x16 = x.astype(jnp.bfloat16)
    w16 = w_stack.astype(jnp.bfloat16)
    p16 = pool_mat.astype(jnp.bfloat16)
    wfc16 = w_fc.astype(jnp.bfloat16)

    flops = (2 * num_layers * (n_pad * f_pad * f_pad + n_pad * n_pad * f_pad)
             + 2 * g * n_pad * f_pad + 2 * g * f_pad * f_fc)
    bytes_accessed = (2 * (a16.size + x16.size + w16.size + p16.size + wfc16.size)
                      + 4 * (gamma.size + beta.size + b_fc.size + g * f_fc))

    # VMEM footprint: double-buffered pipelined blocks + activation scratch +
    # f32 intermediates (xw / agg / epilogue).  Sizes vmem_limit_bytes.
    blk_bytes = ((a16.size + x16.size + p16.size + wfc16.size) * 2
                 + f_pad * f_pad * 2 + 2 * f_pad * 4
                 + b_fc.size * 4 + g * f_fc * 4)
    footprint = 2 * blk_bytes + n_pad * f_pad * 2 + 3 * n_pad * f_pad * 4

    kernel = functools.partial(fused_graph_model_kernel, 1.0 / float(n_true))
    full = lambda shape: pl.BlockSpec(shape, lambda l: (0,) * len(shape))

    grid_spec = pltpu.PrefetchScalarGridSpec(
        num_scalar_prefetch=0,
        grid=(num_layers,),
        in_specs=[
            full(a16.shape),                                        # A resident
            full(x16.shape),                                        # X resident
            pl.BlockSpec((1, f_pad, f_pad), lambda l: (l, 0, 0)),   # W[l] stream
            pl.BlockSpec((1, 1, f_pad), lambda l: (l, 0, 0)),       # gamma[l]
            pl.BlockSpec((1, 1, f_pad), lambda l: (l, 0, 0)),       # beta[l]
            full(p16.shape),                                        # P resident
            full(wfc16.shape),                                      # W_fc resident
            full(b_fc.shape),                                       # b_fc resident
        ],
        out_specs=full((g, f_fc)),
        scratch_shapes=[pltpu.VMEM((n_pad, f_pad), jnp.bfloat16)],  # activations
    )

    return pl.pallas_call(
        kernel,
        out_shape=jax.ShapeDtypeStruct((g, f_fc), jnp.float32),
        grid_spec=grid_spec,
        compiler_params=pltpu.CompilerParams(
            dimension_semantics=("arbitrary",),
            vmem_limit_bytes=_vmem_limit_bytes(footprint)),
        cost_estimate=pl.CostEstimate(flops=flops,
                                      transcendentals=num_layers * f_pad,
                                      bytes_accessed=bytes_accessed),
    )(a16, x16, w16, gamma, beta, p16, wfc16, b_fc)


def build_normalized_adjacency(edge_index, num_nodes):
    """Dense GCN propagation matrix A_hat = D^{-1/2}(A + I)D^{-1/2} (glue)."""
    src, dst = edge_index[0], edge_index[1]
    adj = jnp.zeros((num_nodes, num_nodes), jnp.float32)
    adj = adj.at[dst, src].set(1.0)
    adj = adj + jnp.eye(num_nodes, dtype=jnp.float32)      # self loops
    deg = jnp.sum(adj, axis=1)
    d_inv_sqrt = jax.lax.rsqrt(jnp.maximum(deg, 1e-12))
    return adj * d_inv_sqrt[:, None] * d_inv_sqrt[None, :]


class GraphModelPallas:
    """GraphModel forward: GCN+BN+ReLU stack -> mean GraphPool -> post FC."""

    def __init__(self, key, node_features_len, hidden_sizes, fc_units=256):
        dims = [node_features_len] + list(hidden_sizes)
        self.f_pad = _round_up(max(dims + [_LANE]), _LANE)  # lane-dense features
        w_stack, gammas, betas = [], [], []
        f_in = node_features_len
        for f_out in hidden_sizes:
            key, kw = jax.random.split(key)
            w = jax.random.normal(kw, (f_in, f_out), jnp.float32) / jnp.sqrt(f_in)
            w_p = jnp.zeros((self.f_pad, self.f_pad), jnp.float32)
            w_p = w_p.at[:f_in, :f_out].set(w)
            w_stack.append(w_p)
            gammas.append(jnp.zeros((1, self.f_pad), jnp.float32).at[:, :f_out].set(1.0))
            betas.append(jnp.zeros((1, self.f_pad), jnp.float32))
            f_in = f_out
        self.w_stack = jnp.stack(w_stack)   # [L, Fp, Fp]
        self.gamma = jnp.stack(gammas)      # [L, 1, Fp]
        self.beta = jnp.stack(betas)        # [L, 1, Fp]

        key, kf, kb = jax.random.split(key, 3)
        w_fc = (jax.random.normal(kf, (hidden_sizes[-1], fc_units), jnp.float32)
                / jnp.sqrt(hidden_sizes[-1]))
        self.w_fc = jnp.zeros((self.f_pad, fc_units), jnp.float32)
        self.w_fc = self.w_fc.at[:hidden_sizes[-1], :].set(w_fc)
        self.b_fc = jax.random.normal(kb, (1, fc_units), jnp.float32) * 0.01

        self.node_features_len = node_features_len
        self.n_out = fc_units
        self._fwd = jax.jit(graph_model_forward, static_argnames=("n_true",))

    def prepare(self, edge_index, batch, num_nodes):
        """Precompute (cache) padded A_hat and mean-pool matrix once per batch."""
        n_pad = _round_up(max(num_nodes, _LANE), _LANE)
        a_hat = build_normalized_adjacency(edge_index, num_nodes)
        a_hat = jnp.pad(a_hat, ((0, n_pad - num_nodes), (0, n_pad - num_nodes)))
        num_graphs = int(jnp.max(batch)) + 1
        one_hot = (batch[None, :] == jnp.arange(num_graphs)[:, None]).astype(jnp.float32)
        counts = jnp.maximum(jnp.sum(one_hot, axis=1, keepdims=True), 1.0)
        pool_mat = one_hot / counts                         # 'mean' GraphPool
        pool_mat = jnp.pad(pool_mat, ((0, 0), (0, n_pad - num_nodes)))
        return a_hat, pool_mat

    def __call__(self, x, a_hat, pool_mat, n_true):
        n, f = x.shape
        n_pad = a_hat.shape[0]
        x = jnp.pad(x, ((0, n_pad - n), (0, self.f_pad - f)))   # lane/MXU padding
        return self._fwd(a_hat, x, self.w_stack, self.gamma, self.beta,
                         pool_mat, self.w_fc, self.b_fc, n_true=n_true)


if __name__ == "__main__":
    key = jax.random.PRNGKey(0)

    # 2 graphs x 16 nodes, 128 input node features; GCN widths 128 (from the
    # spec's n_units_list) so every feature dim is lane-dense; post-FC = 256.
    nodes_per_graph = 16
    num_graphs = 2
    num_nodes = nodes_per_graph * num_graphs
    node_features_len = 128
    hidden_sizes = [128, 128]

    key, kx = jax.random.split(key)
    x = jax.random.normal(kx, (num_nodes, node_features_len), jnp.float32)

    # Two disjoint ring graphs + a few chords each (deterministic, global ids).
    edges_src, edges_dst = [], []
    for g in range(num_graphs):
        base = g * nodes_per_graph
        s = jnp.arange(nodes_per_graph, dtype=jnp.int32) + base
        d = (jnp.arange(nodes_per_graph, dtype=jnp.int32) + 1) % nodes_per_graph + base
        cs = jnp.array([0, 3, 5, 7], dtype=jnp.int32) + base
        cd = jnp.array([8, 11, 13, 2], dtype=jnp.int32) + base
        edges_src += [s, d, cs, cd]
        edges_dst += [d, s, cd, cs]
    edge_index = jnp.stack([jnp.concatenate(edges_src),
                            jnp.concatenate(edges_dst)], axis=0)   # [2, num_edges]
    batch = jnp.repeat(jnp.arange(num_graphs, dtype=jnp.int32), nodes_per_graph)

    model = GraphModelPallas(key, node_features_len, hidden_sizes, fc_units=256)
    a_hat, pool_mat = model.prepare(edge_index, batch, num_nodes)  # cached, reused
    out = model(x, a_hat, pool_mat, num_nodes)
    out = jax.block_until_ready(out)

    assert out.shape == (num_graphs, model.n_out)
    assert jnp.all(jnp.isfinite(out))
    print("KERNEL_OK")
</pallas_src>

<mosaic_0001>
module attributes {stable_mosaic.version = 11 : i64} {
  func.func @fused_graph_model_kernel(%arg0: i32, %arg1: memref<128x128xbf16, #tpu.memory_space<vmem>>, %arg2: memref<128x128xbf16, #tpu.memory_space<vmem>>, %arg3: memref<1x128x128xbf16, #tpu.memory_space<vmem>>, %arg4: memref<1x1x128xf32, #tpu.memory_space<vmem>>, %arg5: memref<1x1x128xf32, #tpu.memory_space<vmem>>, %arg6: memref<2x128xbf16, #tpu.memory_space<vmem>>, %arg7: memref<128x256xbf16, #tpu.memory_space<vmem>>, %arg8: memref<1x256xf32, #tpu.memory_space<vmem>>, %arg9: memref<2x256xf32, #tpu.memory_space<vmem>>, %arg10: memref<128x128xbf16, #tpu.memory_space<vmem>>) attributes {dimension_semantics = [#tpu.dimension_semantics<arbitrary>], iteration_bounds = array<i64: 2>, scalar_prefetch = 0 : i64, scratch_operands = 1 : i64, tpu.core_type = #tpu.core_type<tc>, window_params = [{pipeline_mode = #tpu.pipeline_mode<synchronous>, transform_indices = @transform_0, window_bounds = array<i64: 128, 128>}, {pipeline_mode = #tpu.pipeline_mode<synchronous>, transform_indices = @transform_1, window_bounds = array<i64: 128, 128>}, {transform_indices = @transform_2, window_bounds = array<i64: 1, 128, 128>}, {transform_indices = @transform_3, window_bounds = array<i64: 1, 1, 128>}, {transform_indices = @transform_4, window_bounds = array<i64: 1, 1, 128>}, {pipeline_mode = #tpu.pipeline_mode<synchronous>, transform_indices = @transform_5, window_bounds = array<i64: 2, 128>}, {pipeline_mode = #tpu.pipeline_mode<synchronous>, transform_indices = @transform_6, window_bounds = array<i64: 128, 256>}, {pipeline_mode = #tpu.pipeline_mode<synchronous>, transform_indices = @transform_7, window_bounds = array<i64: 1, 256>}, {pipeline_mode = #tpu.pipeline_mode<synchronous>, transform_indices = @transform_8, window_bounds = array<i64: 2, 256>}]} {
    %c0_i32 = arith.constant 0 : i32
    %0 = arith.cmpi eq, %arg0, %c0_i32 : i32
    %1 = arith.extui %0 : i1 to i32
    %c0_i32_0 = arith.constant 0 : i32
    %2 = arith.cmpi ne, %1, %c0_i32_0 : i32
    scf.if %2 {
      %c0_24 = arith.constant 0 : index
      %c0_25 = arith.constant 0 : index
      %44 = vector.load %arg2[%c0_24, %c0_25] : memref<128x128xbf16, #tpu.memory_space<vmem>>, vector<128x128xbf16>
      %c0_26 = arith.constant 0 : index
      %c0_27 = arith.constant 0 : index
      %45 = vector.load %arg10[%c0_26, %c0_27] : memref<128x128xbf16, #tpu.memory_space<vmem>>, vector<128x128xbf16>
      tpu.vector_store %arg10[%c0_26, %c0_27], %44 {strides = array<i32>} : memref<128x128xbf16, #tpu.memory_space<vmem>>, vector<128x128xbf16>,
    } else {
    }
    %c0 = arith.constant 0 : index
    %c0_1 = arith.constant 0 : index
    %3 = vector.load %arg10[%c0, %c0_1] : memref<128x128xbf16, #tpu.memory_space<vmem>>, vector<128x128xbf16>
    %c0_2 = arith.constant 0 : index
    %c0_3 = arith.constant 0 : index
    %c0_4 = arith.constant 0 : index
    %4 = vector.load %arg3[%c0_2, %c0_3, %c0_4] : memref<1x128x128xbf16, #tpu.memory_space<vmem>>, vector<1x128x128xbf16>
    %5 = vector.shape_cast %4 : vector<1x128x128xbf16> to vector<128x128xbf16>
    %cst = arith.constant dense<0.000000e+00> : vector<128x128xf32>
    %6 = tpu.matmul %3, %5, %cst {dimension_numbers = #tpu.dot_dimension_numbers<[1], [0], [0], [1], [0, 0, 1, 1], [], []>} : vector<128x128xbf16>, vector<128x128xbf16>, vector<128x128xf32> -> vector<128x128xf32>
    %c0_5 = arith.constant 0 : index
    %c0_6 = arith.constant 0 : index
    %7 = vector.load %arg1[%c0_5, %c0_6] : memref<128x128xbf16, #tpu.memory_space<vmem>>, vector<128x128xbf16>
    %8 = arith.truncf %6 : vector<128x128xf32> to vector<128x128xbf16>
    %cst_7 = arith.constant dense<0.000000e+00> : vector<128x128xf32>
    %9 = tpu.matmul %7, %8, %cst_7 {dimension_numbers = #tpu.dot_dimension_numbers<[1], [0], [0], [1], [0, 0, 1, 1], [], []>} : vector<128x128xbf16>, vector<128x128xbf16>, vector<128x128xf32> -> vector<128x128xf32>
    %cst_8 = arith.constant dense<0.000000e+00> : vector<128xf32>
    %10 = vector.multi_reduction <add>, %9, %cst_8 [0] : vector<128x128xf32> to vector<128xf32>
    %11 = vector.shape_cast %10 : vector<128xf32> to vector<1x128xf32>
    %12 = arith.mulf %9, %9 : vector<128x128xf32>
    %cst_9 = arith.constant dense<0.000000e+00> : vector<128xf32>
    %13 = vector.multi_reduction <add>, %12, %cst_9 [0] : vector<128x128xf32> to vector<128xf32>
    %14 = vector.shape_cast %13 : vector<128xf32> to vector<1x128xf32>
    %cst_10 = arith.constant 3.125000e-02 : f32
    %15 = vector.broadcast %cst_10 : f32 to vector<1x128xf32>
    %16 = arith.mulf %11, %15 : vector<1x128xf32>
    %cst_11 = arith.constant 3.125000e-02 : f32
    %17 = vector.broadcast %cst_11 : f32 to vector<1x128xf32>
    %18 = arith.mulf %14, %17 : vector<1x128xf32>
    %19 = arith.mulf %16, %16 : vector<1x128xf32>
    %20 = arith.subf %18, %19 : vector<1x128xf32>
    %cst_12 = arith.constant 0.000000e+00 : f32
    %21 = vector.broadcast %cst_12 : f32 to vector<1x128xf32>
    %22 = arith.maximumf %20, %21 : vector<1x128xf32>
    %cst_13 = arith.constant 9.99999974E-6 : f32
    %23 = vector.broadcast %cst_13 : f32 to vector<1x128xf32>
    %24 = arith.addf %22, %23 : vector<1x128xf32>
    %25 = math.rsqrt %24 : vector<1x128xf32>
    %c0_14 = arith.constant 0 : index
    %c0_15 = arith.constant 0 : index
    %c0_16 = arith.constant 0 : index
    %26 = vector.load %arg4[%c0_14, %c0_15, %c0_16] : memref<1x1x128xf32, #tpu.memory_space<vmem>>, vector<1x1x128xf32>
    %27 = vector.shape_cast %26 : vector<1x1x128xf32> to vector<1x128xf32>
    %28 = arith.mulf %27, %25 : vector<1x128xf32>
    %c0_17 = arith.constant 0 : index
    %c0_18 = arith.constant 0 : index
    %c0_19 = arith.constant 0 : index
    %29 = vector.load %arg5[%c0_17, %c0_18, %c0_19] : memref<1x1x128xf32, #tpu.memory_space<vmem>>, vector<1x1x128xf32>
    %30 = vector.shape_cast %29 : vector<1x1x128xf32> to vector<1x128xf32>
    %31 = arith.mulf %16, %28 : vector<1x128xf32>
    %32 = arith.subf %30, %31 : vector<1x128xf32>
    %33 = vector.broadcast %28 : vector<1x128xf32> to vector<128x128xf32>
    %34 = arith.mulf %9, %33 : vector<128x128xf32>
    %35 = vector.broadcast %32 : vector<1x128xf32> to vector<128x128xf32>
    %36 = arith.addf %34, %35 : vector<128x128xf32>
    %cst_20 = arith.constant 0.000000e+00 : f32
    %37 = vector.broadcast %cst_20 : f32 to vector<128x128xf32>
    %38 = arith.maximumf %36, %37 : vector<128x128xf32>
    %39 = arith.truncf %38 : vector<128x128xf32> to vector<128x128xbf16>
    %c0_21 = arith.constant 0 : index
    %c0_22 = arith.constant 0 : index
    %40 = vector.load %arg10[%c0_21, %c0_22] : memref<128x128xbf16, #tpu.memory_space<vmem>>, vector<128x128xbf16>
    tpu.vector_store %arg10[%c0_21, %c0_22], %39 {strides = array<i32>} : memref<128x128xbf16, #tpu.memory_space<vmem>>, vector<128x128xbf16>,
    %c1_i32 = arith.constant 1 : i32
    %41 = arith.cmpi eq, %arg0, %c1_i32 : i32
    %42 = arith.extui %41 : i1 to i32
    %c0_i32_23 = arith.constant 0 : i32
    %43 = arith.cmpi ne, %42, %c0_i32_23 : i32
    scf.if %43 {
      %c0_24 = arith.constant 0 : index
      %c0_25 = arith.constant 0 : index
      %44 = vector.load %arg6[%c0_24, %c0_25] : memref<2x128xbf16, #tpu.memory_space<vmem>>, vector<2x128xbf16>
      %cst_26 = arith.constant dense<0.000000e+00> : vector<2x128xf32>
      %45 = tpu.matmul %44, %39, %cst_26 {dimension_numbers = #tpu.dot_dimension_numbers<[1], [0], [0], [1], [0, 0, 1, 1], [], []>} : vector<2x128xbf16>, vector<128x128xbf16>, vector<2x128xf32> -> vector<2x128xf32>
      %46 = arith.truncf %45 : vector<2x128xf32> to vector<2x128xbf16>
      %c0_27 = arith.constant 0 : index
      %c0_28 = arith.constant 0 : index
      %47 = vector.load %arg7[%c0_27, %c0_28] : memref<128x256xbf16, #tpu.memory_space<vmem>>, vector<128x256xbf16>
      %cst_29 = arith.constant dense<0.000000e+00> : vector<2x256xf32>
      %48 = tpu.matmul %46, %47, %cst_29 {dimension_numbers = #tpu.dot_dimension_numbers<[1], [0], [0], [1], [0, 0, 1, 1], [], []>} : vector<2x128xbf16>, vector<128x256xbf16>, vector<2x256xf32> -> vector<2x256xf32>
      %c0_30 = arith.constant 0 : index
      %c0_31 = arith.constant 0 : index
      %49 = vector.load %arg8[%c0_30, %c0_31] : memref<1x256xf32, #tpu.memory_space<vmem>>, vector<1x256xf32>
      %50 = vector.broadcast %49 : vector<1x256xf32> to vector<2x256xf32>
      %51 = arith.addf %48, %50 : vector<2x256xf32>
      %cst_32 = arith.constant 0.000000e+00 : f32
      %52 = vector.broadcast %cst_32 : f32 to vector<2x256xf32>
      %53 = arith.maximumf %51, %52 : vector<2x256xf32>
      %c0_33 = arith.constant 0 : index
      %c0_34 = arith.constant 0 : index
      %54 = vector.load %arg9[%c0_33, %c0_34] : memref<2x256xf32, #tpu.memory_space<vmem>>, vector<2x256xf32>
      tpu.vector_store %arg9[%c0_33, %c0_34], %53 {strides = array<i32>} : memref<2x256xf32, #tpu.memory_space<vmem>>, vector<2x256xf32>,
    } else {
    }
    return
  }
  func.func @transform_0(%arg0: i32) -> (i32, i32) {
    %c0_i32 = arith.constant 0 : i32
    %c0_i32_0 = arith.constant 0 : i32
    %c0_i32_1 = arith.constant 0 : i32
    return %c0_i32, %c0_i32_0 : i32, i32
  }
  func.func @transform_1(%arg0: i32) -> (i32, i32) {
    %c0_i32 = arith.constant 0 : i32
    %c0_i32_0 = arith.constant 0 : i32
    %c0_i32_1 = arith.constant 0 : i32
    return %c0_i32, %c0_i32_0 : i32, i32
  }
  func.func @transform_2(%arg0: i32) -> (i32, i32, i32) {
    %c0_i32 = arith.constant 0 : i32
    %c0_i32_0 = arith.constant 0 : i32
    %c0_i32_1 = arith.constant 0 : i32
    return %arg0, %c0_i32, %c0_i32_0 : i32, i32, i32
  }
  func.func @transform_3(%arg0: i32) -> (i32, i32, i32) {
    %c0_i32 = arith.constant 0 : i32
    %c0_i32_0 = arith.constant 0 : i32
    %c0_i32_1 = arith.constant 0 : i32
    return %arg0, %c0_i32, %c0_i32_0 : i32, i32, i32
  }
  func.func @transform_4(%arg0: i32) -> (i32, i32, i32) {
    %c0_i32 = arith.constant 0 : i32
    %c0_i32_0 = arith.constant 0 : i32
    %c0_i32_1 = arith.constant 0 : i32
    return %arg0, %c0_i32, %c0_i32_0 : i32, i32, i32
  }
  func.func @transform_5(%arg0: i32) -> (i32, i32) {
    %c0_i32 = arith.constant 0 : i32
    %c0_i32_0 = arith.constant 0 : i32
    %c0_i32_1 = arith.constant 0 : i32
    return %c0_i32, %c0_i32_0 : i32, i32
  }
  func.func @transform_6(%arg0: i32) -> (i32, i32) {
    %c0_i32 = arith.constant 0 : i32
    %c0_i32_0 = arith.constant 0 : i32
    %c0_i32_1 = arith.constant 0 : i32
    return %c0_i32, %c0_i32_0 : i32, i32
  }
  func.func @transform_7(%arg0: i32) -> (i32, i32) {
    %c0_i32 = arith.constant 0 : i32
    %c0_i32_0 = arith.constant 0 : i32
    %c0_i32_1 = arith.constant 0 : i32
    return %c0_i32, %c0_i32_0 : i32, i32
  }
  func.func @transform_8(%arg0: i32) -> (i32, i32) {
    %c0_i32 = arith.constant 0 : i32
    %c0_i32_0 = arith.constant 0 : i32
    %c0_i32_1 = arith.constant 0 : i32
    return %c0_i32, %c0_i32_0 : i32, i32
  }
}

</mosaic_0001>

<bundles_post_ra>
// kernel: graph_model_forward.1
= control target key start
LH: loop header
LB: loop body
LE: loop exit
PB: predicated region body
PF: predicated region fallthrough
CT: control target
= control target key end

     0   :  { %13 = vsyncpa [#allocation4], 0  ;;  %s1488_s27 = smov 0   ;;  %s1745_s0 = inlined_call_operand.vmem [shape: bf16[128,128], index: 0, kind: input, shape index: {}]   ;;  %s1746_s1 = inlined_call_operand.vmem [shape: bf16[128,128], index: 1, kind: input, shape index: {}]   ;;  %s1747_s2 = inlined_call_operand.vmem [shape: bf16[2,128,128], index: 2, kind: input, shape index: {}]   ;;  %s1748_s3 = inlined_call_operand.vmem [shape: f32[2,1,128], index: 3, kind: input, shape index: {}]   ;;  %s1749_s4 = inlined_call_operand.vmem [shape: f32[2,1,128], index: 4, kind: input, shape index: {}]   ;;  %s1750_s5 = inlined_call_operand.vmem [shape: bf16[2,128], index: 5, kind: input, shape index: {}]   ;;  %s1751_s6 = inlined_call_operand.vmem [shape: bf16[128,256], index: 6, kind: input, shape index: {}]   ;;  %s1752_s7 = inlined_call_operand.vmem [shape: f32[1,256], index: 7, kind: input, shape index: {}]   ;;  %s1753_s8 = inlined_call_operand.hbm [shape: f32[2,256], index: 8, kind: output, shape index: {}]  }
   0x1 LB: > { %s1494_s28 = sadd.s32 4294967295, %s1437_s27   ;;  %p1157_p0 = scmp.ge.s32.totalorder %s1437_s27, 1  ;;  %s1437_s27 = sphi %s1488_s27, %s19_s27  }
   0x2   : > { %p274_p1 = scmp.lt.s32.totalorder %s1437_s27, 3 }
   0x4   : > { %p275_p2 = pnand %p1157_p0, %p274_p1 }
   0x5   : > { %p309_p3 = scmp.lt.s32.totalorder (!%p275_p2), %s1494_s28, 1  ;;  %p1160_p4 = scmp.ne.s32.totalorder (!%p275_p2), %s1494_s28, 0 }
   0x6   : > { %278 = sbr.rel (%p275_p2) target bundleno = 1091 (0x443), region = 52 }
   0xd   : > { %s1500_s29 = scalar_select %p309_p3, %s1494_s28, 1 }
   0xe   : > { %324 = sbr.rel (%p1160_p4) target bundleno = 21 (0x15), region = 56  ;;  %v1351_v0 = vld [vmem:[%s1746_s1] sm:$0xff] (!%p1160_p4)   ;;  %v1352_v1 = vld [vmem:[%s1746_s1 + $0x8] sm:$0xff] (!%p1160_p4)   ;;  %v1353_v2 = vld [vmem:[%s1746_s1 + $0x10] sm:$0xff] (!%p1160_p4)  }
   0xf   : > { %s1207_s30 = sshll.u32 %s1500_s29, 6  ;;  %s316_s11 = scalar_lea.vmem %s1748_s3, %s1500_s29  ;;  %389 = vst [vmem:[#allocation2] sm:$0xff] (!%p1160_p4), %v1351_v0  ;;  %390 = vst [vmem:[#allocation2 + $0x8] sm:$0xff] (!%p1160_p4), %v1352_v1  ;;  %v1354_v3 = vld [vmem:[%s1746_s1 + $0x18] sm:$0xff] (!%p1160_p4)   ;;  %v1355_v4 = vld [vmem:[%s1746_s1 + $0x20] sm:$0xff] (!%p1160_p4)  }
  0x10   : > { %s1510_s14 = scalar_lea.vmem %s1747_s2, %s1207_s30  ;;  %s319_s17 = scalar_lea.vmem %s1749_s4, %s1500_s29  ;;  %391 = vst [vmem:[#allocation2 + $0x10] sm:$0xff] (!%p1160_p4), %v1353_v2  ;;  %392 = vst [vmem:[#allocation2 + $0x18] sm:$0xff] (!%p1160_p4), %v1354_v3  ;;  %v1356_v5 = vld [vmem:[%s1746_s1 + $0x28] sm:$0xff] (!%p1160_p4)   ;;  %v1357_v6 = vld [vmem:[%s1746_s1 + $0x30] sm:$0xff] (!%p1160_p4)  }
  0x11   : > { %393 = vst [vmem:[#allocation2 + $0x20] sm:$0xff] (!%p1160_p4), %v1355_v4  ;;  %394 = vst [vmem:[#allocation2 + $0x28] sm:$0xff] (!%p1160_p4), %v1356_v5  ;;  %v1358_v7 = vld [vmem:[%s1746_s1 + $0x38] sm:$0xff] (!%p1160_p4)  }
  0x12   : > { %395 = vst [vmem:[#allocation2 + $0x30] sm:$0xff] (!%p1160_p4), %v1357_v6  ;;  %396 = vst [vmem:[#allocation2 + $0x38] sm:$0xff] (!%p1160_p4), %v1358_v7 }
  0x15 PF: > { %v1359_v8 = vld [vmem:[%s1510_s14] sm:$0xff]   ;;  %v1360_v9 = vld [vmem:[%s1510_s14 + $0x8] sm:$0xff]   ;;  %v1361_v10 = vld [vmem:[%s1510_s14 + $0x10] sm:$0xff]   ;;  %p1185_p5 = scmp.ne.s32.totalorder %s1494_s28, 1 }
  0x16   : > { %1249 = vmatprep.subr.bf16.mxu0 %v1359_v8  ;;  %v1362_v11 = vld [vmem:[%s1510_s14 + $0x18] sm:$0xff]   ;;  %v397_v12 = vld [vmem:[#allocation2] sm:$0xff]  ;;  %v1364_v14 = vld [vmem:[%s1510_s14 + $0x28] sm:$0xff]   ;;  %vm1440_vm0 = vmmov (!%p1185_p5), 0  }
  0x17   : > { %1250 = vmatpush3.bf16.msra.mxu0 %v1359_v8  ;;  %1265 = vmatprep.mubr.bf16.mxu0 %v397_v12  ;;  %v1363_v13 = vld [vmem:[%s1510_s14 + $0x20] sm:$0xff]   ;;  %v1365_v15 = vld [vmem:[%s1510_s14 + $0x30] sm:$0xff]   ;;  %v1366_v16 = vld [vmem:[%s1510_s14 + $0x38] sm:$0xff]  }
  0x18   : > { %1251 = vmatprep.subr.bf16.mxu0 %v1360_v9  ;;  %v398_v17 = vld [vmem:[#allocation2 + $0x8] sm:$0xff]  ;;  %v399_v18 = vld [vmem:[#allocation2 + $0x10] sm:$0xff]  ;;  %v400_v19 = vld [vmem:[#allocation2 + $0x18] sm:$0xff] }
  0x19   : > { %v401_v20 = vld [vmem:[#allocation2 + $0x20] sm:$0xff]  ;;  %v402_v21 = vld [vmem:[#allocation2 + $0x28] sm:$0xff]  ;;  %v403_v22 = vld [vmem:[#allocation2 + $0x30] sm:$0xff] }
  0x1a   : > { %v404_v23 = vld [vmem:[#allocation2 + $0x38] sm:$0xff]  ;;  %v1367_v24 = vld [vmem:[%s1745_s0] sm:$0xff]   ;;  %v1368_v49 = vld [vmem:[%s1745_s0 + $0x8] sm:$0xff]  }
  0x1b   : > { %1252 = vmatpush3.bf16.msra.mxu0 %v1360_v9  ;;  %1297 = vmatprep.mubr.bf16.mxu1 %v1367_v24  ;;  %v1369_v50 = vld [vmem:[%s1745_s0 + $0x10] sm:$0xff]   ;;  %v1370_v51 = vld [vmem:[%s1745_s0 + $0x18] sm:$0xff]   ;;  %v1371_v52 = vld [vmem:[%s1745_s0 + $0x20] sm:$0xff]  }
  0x1c   : > { %1253 = vmatprep.subr.bf16.mxu0 %v1361_v10  ;;  %v1372_v53 = vld [vmem:[%s1745_s0 + $0x28] sm:$0xff]   ;;  %v1373_v54 = vld [vmem:[%s1745_s0 + $0x30] sm:$0xff]   ;;  %v1374_v55 = vld [vmem:[%s1745_s0 + $0x38] sm:$0xff]  }
  0x1f   : > { %1254 = vmatpush3.bf16.msra.mxu0 %v1361_v10 }
  0x20   : > { %1255 = vmatprep.subr.bf16.mxu0 %v1362_v11 }
  0x23   : > { %1256 = vmatpush3.bf16.msra.mxu0 %v1362_v11 }
  0x24   : > { %1257 = vmatprep.subr.bf16.mxu0 %v1363_v13 }
  0x27   : > { %1258 = vmatpush3.bf16.msra.mxu0 %v1363_v13 }
  0x28   : > { %1259 = vmatprep.subr.bf16.mxu0 %v1364_v14 }
  0x2b   : > { %1260 = vmatpush3.bf16.msra.mxu0 %v1364_v14 }
  0x2c   : > { %1261 = vmatprep.subr.bf16.mxu0 %v1365_v15 }
  0x2f   : > { %1262 = vmatpush3.bf16.msra.mxu0 %v1365_v15 }
  0x30   : > { %1263 = vmatprep.subr.bf16.mxu0 %v1366_v16 }
  0x33   : > { %1264 = vmatpush3.bf16.msra.mxu0 %v1366_v16 }
  0x36   : > { %1266 = vmatmul.mubr.bf16.vlgmr.msra.gmra.mrb[0].mxu0 %v398_v17 }
  0x37   : > { %1269 = vmatprep.mubr.bf16.mxu0 %v399_v18 }
  0x3e   : > { %1270 = vmatmul.mubr.bf16.gmra.mrb[4].mxu0 %v400_v19 }
  0x3f   : > { %1273 = vmatprep.mubr.bf16.mxu0 %v401_v20 }
  0x46   : > { %1274 = vmatmul.mubr.bf16.gmra.mrb[8].mxu0 %v402_v21 }
  0x47   : > { %1277 = vmatprep.mubr.bf16.mxu0 %v403_v22 }
  0x4e   : > { %1278 = vmatmul.mubr.bf16.gmra.mrb[12].mxu0 %v404_v23 }
 0x109   : > { %v1267_v25 = vpop.f32.mrb[0].mxu0 }
 0x10a   : > { %v503_v26 = vpop.f32.mrb[1].mxu0 }
 0x10b   : > { %v1268_v27 = vpop.f32.mrb[2].mxu0 }
 0x10c   : > { %v583_v28 = vpack.c.bf16 %v1268_v27, %v1267_v25  ;;  %v506_v29 = vpop.f32.mrb[3].mxu0 }
 0x10d   : > { %v582_v30 = vpack.c.bf16 %v506_v29, %v503_v26 }
 0x10f   : > { %1281 = vmatprep.subr.bf16.mxu1 %v582_v30 }
 0x110   : > { %1282 = vmatpush3.bf16.msra.mxu1 %v582_v30 }
 0x111   : > { %v1271_v31 = vpop.f32.mrb[4].mxu0  ;;  %1283 = vmatprep.subr.bf16.mxu1 %v583_v28 }
 0x112   : > { %v519_v32 = vpop.f32.mrb[5].mxu0 }
 0x113   : > { %v1272_v33 = vpop.f32.mrb[6].mxu0 }
 0x114   : > { %v585_v34 = vpack.c.bf16 %v1272_v33, %v1271_v31  ;;  %v522_v35 = vpop.f32.mrb[7].mxu0  ;;  %1284 = vmatpush3.bf16.msra.mxu1 %v583_v28 }
 0x115   : > { %v584_v36 = vpack.c.bf16 %v522_v35, %v519_v32 }
 0x117   : > { %1285 = vmatprep.subr.bf16.mxu1 %v584_v36 }
 0x118   : > { %1286 = vmatpush3.bf16.msra.mxu1 %v584_v36 }
 0x119   : > { %v1275_v37 = vpop.f32.mrb[8].mxu0  ;;  %1287 = vmatprep.subr.bf16.mxu1 %v585_v34 }
 0x11a   : > { %v535_v38 = vpop.f32.mrb[9].mxu0 }
 0x11b   : > { %v1276_v39 = vpop.f32.mrb[10].mxu0 }
 0x11c   : > { %v587_v40 = vpack.c.bf16 %v1276_v39, %v1275_v37  ;;  %v538_v41 = vpop.f32.mrb[11].mxu0  ;;  %1288 = vmatpush3.bf16.msra.mxu1 %v585_v34 }
 0x11d   : > { %v586_v42 = vpack.c.bf16 %v538_v41, %v535_v38 }
 0x11f   : > { %1289 = vmatprep.subr.bf16.mxu1 %v586_v42 }
 0x120   : > { %1290 = vmatpush3.bf16.msra.mxu1 %v586_v42 }
 0x121   : > { %v1279_v43 = vpop.f32.mrb[12].mxu0  ;;  %1291 = vmatprep.subr.bf16.mxu1 %v587_v40 }
 0x122   : > { %v551_v44 = vpop.f32.mrb[13].mxu0 }
 0x123   : > { %v1280_v45 = vpop.f32.mrb[14].mxu0 }
 0x124   : > { %v589_v46 = vpack.c.bf16 %v1280_v45, %v1279_v43  ;;  %v554_v47 = vpop.f32.mrb[15].mxu0  ;;  %1292 = vmatpush3.bf16.msra.mxu1 %v587_v40 }
 0x125   : > { %v588_v48 = vpack.c.bf16 %v554_v47, %v551_v44 }
 0x127   : > { %1293 = vmatprep.subr.bf16.mxu1 %v588_v48 }
 0x128   : > { %1294 = vmatpush3.bf16.msra.mxu1 %v588_v48 }
 0x129   : > { %1295 = vmatprep.subr.bf16.mxu1 %v589_v46 }
 0x12c   : > { %1296 = vmatpush3.bf16.msra.mxu1 %v589_v46 }
 0x12f   : > { %1298 = vmatmul.mubr.bf16.vlgmr.msra.gmra.mrb[0].mxu1 %v1368_v49 }
 0x130   : > { %1301 = vmatprep.mubr.bf16.mxu1 %v1369_v50 }
 0x137   : > { %1302 = vmatmul.mubr.bf16.gmra.mrb[4].mxu1 %v1370_v51 }
 0x138   : > { %1305 = vmatprep.mubr.bf16.mxu1 %v1371_v52 }
 0x13f   : > { %1306 = vmatmul.mubr.bf16.gmra.mrb[8].mxu1 %v1372_v53 }
 0x140   : > { %1309 = vmatprep.mubr.bf16.mxu1 %v1373_v54 }
 0x147   : > { %1310 = vmatmul.mubr.bf16.gmra.mrb[12].mxu1 %v1374_v55 }
 0x202   : > { %v1573_v56 = vpop.f32.mrb[0].mxu1 }
 0x203   : > { %v1575_v57 = vpop.f32.mrb[1].mxu1  ;;  %v758_v63 = vmul.f32 %v1573_v56, %v1573_v56 }
 0x204   : > { %v1577_v58 = vpop.f32.mrb[2].mxu1  ;;  %v756_v60 = vmul.f32 %v1575_v57, %v1575_v57 }
 0x205   : > { %v1579_v59 = vpop.f32.mrb[3].mxu1  ;;  %v759_v2 = vmul.f32 %v1577_v58, %v1577_v58 }
 0x206   : > { %v735_v61 = vadd.f32 %v1579_v59, %v1575_v57  ;;  %v757_v62 = vmul.f32 %v1579_v59, %v1579_v59 }
 0x208   : > { %v736_v0 = vadd.f32 %v1573_v56, %v735_v61  ;;  %v772_v1 = vadd.f32 %v757_v62, %v756_v60 }
 0x20a   : > { %v773_v3 = vadd.f32 %v772_v1, %v758_v63  ;;  %v1592_v4 = vpop.f32.mrb[4].mxu1  ;;  %v737_v5 = vadd.f32 %v1577_v58, %v736_v0 }
 0x20b   : > { %v1595_v6 = vpop.f32.mrb[5].mxu1  ;;  %v762_v15 = vmul.f32 %v1592_v4, %v1592_v4 }
 0x20c   : > { %v738_v7 = vadd.f32 %v737_v5, %v1595_v6  ;;  %v760_v8 = vmul.f32 %v1595_v6, %v1595_v6  ;;  %v774_v9 = vadd.f32 %v773_v3, %v759_v2  ;;  %v1600_v10 = vpop.f32.mrb[6].mxu1 }
 0x20d   : > { %v1602_v11 = vpop.f32.mrb[7].mxu1  ;;  %v763_v18 = vmul.f32 %v1600_v10, %v1600_v10 }
 0x20e   : > { %v775_v12 = vadd.f32 %v774_v9, %v760_v8  ;;  %v739_v13 = vadd.f32 %v738_v7, %v1602_v11  ;;  %v761_v14 = vmul.f32 %v1602_v11, %v1602_v11 }
 0x210   : > { %v740_v16 = vadd.f32 %v1592_v4, %v739_v13  ;;  %v776_v17 = vadd.f32 %v775_v12, %v761_v14 }
 0x212   : > { %v777_v19 = vadd.f32 %v776_v17, %v762_v15  ;;  %v1612_v20 = vpop.f32.mrb[8].mxu1  ;;  %v741_v21 = vadd.f32 %v1600_v10, %v740_v16  ;;  %v806_v16 = vlaneseq }
 0x213   : > { %v1615_v22 = vpop.f32.mrb[9].mxu1  ;;  %v766_v31 = vmul.f32 %v1612_v20, %v1612_v20 }
 0x214   : > { %v742_v23 = vadd.f32 %v741_v21, %v1615_v22  ;;  %v764_v24 = vmul.f32 %v1615_v22, %v1615_v22  ;;  %v778_v25 = vadd.f32 %v777_v19, %v763_v18  ;;  %v1620_v26 = vpop.f32.mrb[10].mxu1  ;;  %v1633_v17 = vshrl.u32 %v806_v16, 7  ;;  %v800_v18 = vld [vmem:[%s316_s11] sm:$0x1] }
 0x215   : > { %v1622_v27 = vpop.f32.mrb[11].mxu1  ;;  %v767_v34 = vmul.f32 %v1620_v26, %v1620_v26 }
 0x216   : > { %v779_v28 = vadd.f32 %v778_v25, %v764_v24  ;;  %v743_v29 = vadd.f32 %v742_v23, %v1622_v27  ;;  %v765_v30 = vmul.f32 %v1622_v27, %v1622_v27  ;;  %v1641_v19 = vsub.s32 0, %v1633_v17  ;;  %v802_v24 = vld [vmem:[%s319_s17] sm:$0x1] }
 0x218   : > { %v744_v32 = vadd.f32 %v1612_v20, %v743_v29  ;;  %v780_v33 = vadd.f32 %v779_v28, %v765_v30 }
 0x21a   : > { %v781_v35 = vadd.f32 %v780_v33, %v766_v31  ;;  %v1311_v36 = vpop.f32.mrb[12].mxu1  ;;  %v745_v37 = vadd.f32 %v1620_v26, %v744_v32 }
 0x21b   : > { %v720_v38 = vpop.f32.mrb[13].mxu1  ;;  %v770_v47 = vmul.f32 %v1311_v36, %v1311_v36 }
 0x21c   : > { %v746_v39 = vadd.f32 %v745_v37, %v720_v38  ;;  %v768_v40 = vmul.f32 %v720_v38, %v720_v38  ;;  %v782_v41 = vadd.f32 %v781_v35, %v767_v34  ;;  %v1312_v42 = vpop.f32.mrb[14].mxu1 }
 0x21d   : > { %v723_v43 = vpop.f32.mrb[15].mxu1  ;;  %v771_v50 = vmul.f32 %v1312_v42, %v1312_v42 }
 0x21e   : > { %v783_v44 = vadd.f32 %v782_v41, %v768_v40  ;;  %v747_v45 = vadd.f32 %v746_v39, %v723_v43  ;;  %v769_v46 = vmul.f32 %v723_v43, %v723_v43 }
 0x220   : > { %v748_v48 = vadd.f32 %v1311_v36, %v747_v45  ;;  %v784_v49 = vadd.f32 %v783_v44, %v769_v46 }
 0x222   : > { %v749_v51 = vadd.f32 %v1312_v42, %v748_v48  ;;  %v785_v52 = vadd.f32 %v784_v49, %v770_v47 }
 0x224   : > { %v750_v53 = vrot.slane %v749_v51, 4  ;;  %v786_v54 = vadd.f32 %v785_v52, %v771_v50 }
 0x226   : > { %v751_v55 = vadd.f32 %v750_v53, %v749_v51  ;;  %v787_v60 = vrot.slane %v786_v54, 4 }
 0x228   : > { %v752_v61 = vrot.slane %v751_v55, 2  ;;  %v788_v62 = vadd.f32 %v787_v60, %v786_v54 }
 0x22a   : > { %v753_v63 = vadd.f32 %v752_v61, %v751_v55  ;;  %v789_v0 = vrot.slane %v788_v62, 2 }
 0x22c   : > { %v754_v1 = vrot.slane %v753_v63, 1  ;;  %v790_v2 = vadd.f32 %v789_v0, %v788_v62 }
 0x22e   : > { %v755_v3 = vadd.f32 %v754_v1, %v753_v63  ;;  %v791_v5 = vrot.slane %v790_v2, 1 }
 0x230   : > { %v792_v7 = vadd.f32 %v791_v5, %v790_v2  ;;  %v793_v8 = vmul.f32 0.03125, %v755_v3 }
 0x232   : > { %v794_v9 = vmul.f32 0.03125, %v792_v7  ;;  %v795_v12 = vmul.f32 %v793_v8, %v793_v8 }
 0x234   : > { %v796_v13 = vsub.f32 %v794_v9, %v795_v12 }
 0x236   : > { %v797_v14 = vmax.f32 %v796_v13, 0.0 }
 0x238   : > { %v798_v15 = vadd.f32 1e-05, %v797_v14 }
 0x23a   : > { %1375 = vrsqrt.f32 %v798_v15 }
 0x244   : > { %v1376_v21 = vpop.eup %1375 }
 0x245   : > { %v801_v23 = vmul.f32 %v1376_v21, %v800_v18 }
 0x247   : > { %v803_v25 = vmul.f32 %v801_v23, %v793_v8  ;;  %v809_v28 = vrot.slane %v801_v23, %v1641_v19  ;;  %v1439_v23 = vmov (!%p1185_p5), 0.0  }
 0x248   : > { %1313 = vmatprep.subr.bf16.mxu0 (!%p1185_p5), %v1439_v23  ;;  %1329 = vmatprep.mubr.msk.bf16.mxu0 (!%p1185_p5), %vm1440_vm0, %v1439_v23 }
 0x249   : > { %v804_v29 = vsub.f32 %v802_v24, %v803_v25  ;;  %v811_v30 = vmul.f32 %v809_v28, %v1575_v57  ;;  %v812_v31 = vmul.f32 %v809_v28, %v1579_v59  ;;  %v813_v32 = vmul.f32 %v1573_v56, %v809_v28  ;;  %v1377_v24 = vld [vmem:[%s1751_s6 + $0x4] ss:$8 sps:$4 sm:$0xff] (!%p1185_p5)   ;;  %v1379_v25 = vld [vmem:[%s1751_s6] ss:$8 sps:$4 sm:$0xff] (!%p1185_p5)  }
 0x24a   : > { %v814_v33 = vmul.f32 %v1577_v58, %v809_v28  ;;  %v815_v34 = vmul.f32 %v809_v28, %v1595_v6  ;;  %v816_v35 = vmul.f32 %v809_v28, %v1602_v11  ;;  %v817_v37 = vmul.f32 %v1592_v4, %v809_v28  ;;  %1035 = vmatprep.subr.bf16.mxu1 (!%p1185_p5), %v1377_v24 }
 0x24b   : > { %v818_v39 = vmul.f32 %v1600_v10, %v809_v28  ;;  %v819_v40 = vmul.f32 %v809_v28, %v1615_v22  ;;  %v820_v41 = vmul.f32 %v809_v28, %v1622_v27  ;;  %v821_v57 = vmul.f32 %v1612_v20, %v809_v28  ;;  %1036 = vmatpush1.bf16.msra.mxu1 (!%p1185_p5), %v1379_v25 }
 0x24c   : > { %v822_v59 = vmul.f32 %v1620_v26, %v809_v28  ;;  %v823_v44 = vmul.f32 %v809_v28, %v720_v38  ;;  %v824_v56 = vmul.f32 %v809_v28, %v723_v43  ;;  %v825_v45 = vmul.f32 %v1311_v36, %v809_v28 }
 0x24d   : > { %v826_v58 = vmul.f32 %v1312_v42, %v809_v28  ;;  %v831_v6 = vrot.slane %v804_v29, %v1641_v19  ;;  %v1380_v28 = vld [vmem:[%s1751_s6 + $0x14] ss:$8 sps:$4 sm:$0xff] (!%p1185_p5)   ;;  %v1382_v29 = vld [vmem:[%s1751_s6 + $0x10] ss:$8 sps:$4 sm:$0xff] (!%p1185_p5)  }
 0x24e   : > { %1037 = vmatprep.subr.bf16.mxu1 (!%p1185_p5), %v1380_v28 }
 0x24f   : > { %v833_v46 = vadd.f32 %v831_v6, %v811_v30  ;;  %v834_v11 = vadd.f32 %v831_v6, %v812_v31  ;;  %v835_v47 = vadd.f32 %v831_v6, %v813_v32  ;;  %v836_v4 = vadd.f32 %v831_v6, %v814_v33  ;;  %v1383_v30 = vld [vmem:[%s1751_s6 + $0x24] ss:$8 sps:$4 sm:$0xff] (!%p1185_p5)   ;;  %1038 = vmatpush1.bf16.msra.mxu1 (!%p1185_p5), %v1382_v29  ;;  %v1385_v31 = vld [vmem:[%s1751_s6 + $0x20] ss:$8 sps:$4 sm:$0xff] (!%p1185_p5)   ;;  %v1386_v32 = vld [vmem:[%s1751_s6 + $0x34] ss:$8 sps:$4 sm:$0xff] (!%p1185_p5)  }
 0x250   : > { %v837_v48 = vadd.f32 %v831_v6, %v815_v34  ;;  %v838_v10 = vadd.f32 %v831_v6, %v816_v35  ;;  %v839_v49 = vadd.f32 %v831_v6, %v817_v37  ;;  %v840_v22 = vadd.f32 %v831_v6, %v818_v39  ;;  %1039 = vmatprep.subr.bf16.mxu1 (!%p1185_p5), %v1383_v30  ;;  %v1388_v33 = vld [vmem:[%s1751_s6 + $0x30] ss:$8 sps:$4 sm:$0xff] (!%p1185_p5)   ;;  %v1389_v34 = vld [vmem:[%s1751_s6 + $0x44] ss:$8 sps:$4 sm:$0xff] (!%p1185_p5)   ;;  %v1391_v35 = vld [vmem:[%s1751_s6 + $0x40] ss:$8 sps:$4 sm:$0xff] (!%p1185_p5)  }
 0x251   : > { %v841_v50 = vadd.f32 %v831_v6, %v819_v40  ;;  %v842_v27 = vadd.f32 %v831_v6, %v820_v41  ;;  %v843_v51 = vadd.f32 %v831_v6, %v821_v57  ;;  %v844_v20 = vadd.f32 %v831_v6, %v822_v59  ;;  %v1392_v37 = vld [vmem:[%s1751_s6 + $0x54] ss:$8 sps:$4 sm:$0xff] (!%p1185_p5)   ;;  %v1394_v39 = vld [vmem:[%s1751_s6 + $0x50] ss:$8 sps:$4 sm:$0xff] (!%p1185_p5)   ;;  %v1395_v40 = vld [vmem:[%s1751_s6 + $0x64] ss:$8 sps:$4 sm:$0xff] (!%p1185_p5)  }
 0x252   : > { %v845_v52 = vadd.f32 %v831_v6, %v823_v44  ;;  %v846_v26 = vadd.f32 %v831_v6, %v824_v56  ;;  %v847_v38 = vadd.f32 %v831_v6, %v825_v45  ;;  %v848_v43 = vadd.f32 %v831_v6, %v826_v58  ;;  %v1397_v41 = vld [vmem:[%s1751_s6 + $0x60] ss:$8 sps:$4 sm:$0xff] (!%p1185_p5)   ;;  %v1398_v57 = vld [vmem:[%s1751_s6 + $0x74] ss:$8 sps:$4 sm:$0xff] (!%p1185_p5)   ;;  %v1400_v44 = vld [vmem:[%s1751_s6 + $0x70] ss:$8 sps:$4 sm:$0xff] (!%p1185_p5)  }
 0x253   : > { %v849_v36 = vmax.f32 %v833_v46, 0.0  ;;  %v850_v42 = vmax.f32 %v834_v11, 0.0  ;;  %v851_v53 = vmax.f32 %v835_v47, 0.0  ;;  %v852_v54 = vmax.f32 %v836_v4, 0.0  ;;  %1040 = vmatpush1.bf16.msra.mxu1 (!%p1185_p5), %v1385_v31  ;;  %v885_v59 = vld [vmem:[%s1750_s5] sm:$0x1] (!%p1185_p5) }
 0x254   : > { %v853_v55 = vmax.f32 %v837_v48, 0.0  ;;  %v854_v60 = vmax.f32 %v838_v10, 0.0  ;;  %v855_v61 = vmax.f32 %v839_v49, 0.0  ;;  %v856_v62 = vmax.f32 %v840_v22, 0.0  ;;  %1041 = vmatprep.subr.bf16.mxu1 (!%p1185_p5), %v1386_v32  ;;  %v943_v47 = vld [vmem:[%s1752_s7] sm:$0x3] (!%p1185_p5) }
 0x255   : > { %v857_v63 = vmax.f32 %v841_v50, 0.0  ;;  %v858_v0 = vmax.f32 %v842_v27, 0.0  ;;  %v859_v1 = vmax.f32 %v843_v51, 0.0  ;;  %v860_v2 = vmax.f32 %v844_v20, 0.0 }
 0x256   : > { %v861_v3 = vmax.f32 %v845_v52, 0.0  ;;  %v862_v5 = vmax.f32 %v846_v26, 0.0  ;;  %v863_v7 = vmax.f32 %v847_v38, 0.0  ;;  %v864_v8 = vmax.f32 %v848_v43, 0.0  ;;  %884 = sbr.rel (%p1185_p5) target bundleno = 1066 (0x42a), region = 60 }
 0x257   : > { %v865_v9 = vpack.c.bf16 %v850_v42, %v849_v36  ;;  %v866_v12 = vpack.c.bf16 %v852_v54, %v851_v53  ;;  %v867_v13 = vpack.c.bf16 %v854_v60, %v853_v55  ;;  %v868_v14 = vpack.c.bf16 %v856_v62, %v855_v61  ;;  %1042 = vmatpush1.bf16.msra.mxu1 (!%p1185_p5), %v1388_v33 }
 0x258   : > { %v869_v15 = vpack.c.bf16 %v858_v0, %v857_v63  ;;  %v870_v16 = vpack.c.bf16 %v860_v2, %v859_v1  ;;  %v871_v18 = vpack.c.bf16 %v862_v5, %v861_v3  ;;  %v872_v21 = vpack.c.bf16 %v864_v8, %v863_v7  ;;  %1043 = vmatprep.subr.bf16.mxu1 (!%p1185_p5), %v1389_v34 }
 0x259   : > { %873 = vst [vmem:[#allocation2] sm:$0xff] %v865_v9  ;;  %874 = vst [vmem:[#allocation2 + $0x8] sm:$0xff] %v866_v12  ;;  %1314 = vmatpush3.bf16.msra.mxu0 (!%p1185_p5), %v865_v9  ;;  %v1441_v56 = vmov (!%p1185_p5), 0   ;;  %v951_v4 = vsub.s32 (!%p1185_p5), 1, %v1633_v17  ;;  %v948_v48 = vrot.slane (!%p1185_p5), %v943_v47, %v1641_v19 }
 0x25a   : > { %875 = vst [vmem:[#allocation2 + $0x10] sm:$0xff] %v867_v13  ;;  %876 = vst [vmem:[#allocation2 + $0x18] sm:$0xff] %v868_v14  ;;  %1315 = vmatprep.subr.bf16.mxu0 (!%p1185_p5), %v1439_v23  ;;  %1067 = vmatprep.mubr.bf16.mxu1 (!%p1185_p5), %v1441_v56 }
 0x25b   : > { %877 = vst [vmem:[#allocation2 + $0x20] sm:$0xff] %v869_v15  ;;  %878 = vst [vmem:[#allocation2 + $0x28] sm:$0xff] %v870_v16  ;;  %1044 = vmatpush1.bf16.msra.mxu1 (!%p1185_p5), %v1391_v35  ;;  %v952_v10 = vrot.slane (!%p1185_p5), %v943_v47, %v951_v4 }
 0x25c   : > { %879 = vst [vmem:[#allocation2 + $0x30] sm:$0xff] %v871_v18  ;;  %880 = vst [vmem:[#allocation2 + $0x38] sm:$0xff] %v872_v21  ;;  %1045 = vmatprep.subr.bf16.mxu1 (!%p1185_p5), %v1392_v37 }
 0x25d   : > { %1316 = vmatpush3.bf16.msra.mxu0 %v866_v12 }
 0x25e   : > { %1317 = vmatprep.subr.bf16.mxu0 %v1439_v23 }
 0x25f   : > { %1046 = vmatpush1.bf16.msra.mxu1 %v1394_v39 }
 0x260   : > { %1047 = vmatprep.subr.bf16.mxu1 %v1395_v40 }
 0x261   : > { %1318 = vmatpush3.bf16.msra.mxu0 %v867_v13 }
 0x262   : > { %1319 = vmatprep.subr.bf16.mxu0 %v1439_v23 }
 0x263   : > { %1048 = vmatpush1.bf16.msra.mxu1 %v1397_v41 }
 0x264   : > { %1049 = vmatprep.subr.bf16.mxu1 %v1398_v57 }
 0x265   : > { %1320 = vmatpush3.bf16.msra.mxu0 %v868_v14 }
 0x266   : > { %1321 = vmatprep.subr.bf16.mxu0 %v1439_v23 }
 0x267   : > { %1050 = vmatpush1.bf16.msra.mxu1 %v1400_v44 }
 0x269   : > { %1322 = vmatpush3.bf16.msra.mxu0 %v869_v15 }
 0x26a   : > { %1323 = vmatprep.subr.bf16.mxu0 %v1439_v23 }
 0x26d   : > { %1324 = vmatpush3.bf16.msra.mxu0 %v870_v16 }
 0x26e   : > { %1325 = vmatprep.subr.bf16.mxu0 %v1439_v23 }
 0x271   : > { %1326 = vmatpush3.bf16.msra.mxu0 %v871_v18 }
 0x272   : > { %1327 = vmatprep.subr.bf16.mxu0 %v1439_v23 }
 0x275   : > { %1328 = vmatpush3.bf16.msra.mxu0 %v872_v21 }
 0x278   : > { %1330 = vmatmul.mubr.bf16.vlgmr.msra.gmra.mrb[0].mxu0 %v885_v59 }
 0x34b   : > { %v920_v45 = vpop.f32.mrb[0].mxu0 }
 0x34c   : > { %v926_v58 = vpack.c.bf16 %v920_v45, %v920_v45  ;;  %v1331_v6 = vpop.f32.mrb[1].mxu0 }
 0x34d   : > { %v923_v46 = vpop.f32.mrb[2].mxu0 }
 0x34e   : > { %v1332_v11 = vpop.f32.mrb[3].mxu0  ;;  %1068 = vmatmul.mubr.bf16.vlgmr.msra.gmra.mrb[0].mxu1 %v926_v58 }
 0x421   : > { %v1069_v49 = vpop.f32.mrb[0].mxu1 }
 0x422   : > { %v1070_v22 = vadd.f32 %v1069_v49, %v948_v48  ;;  %v1071_v50 = vpop.f32.mrb[1].mxu1 }
 0x423   : > { %v1072_v27 = vadd.f32 %v1071_v50, %v952_v10  ;;  %v1073_v51 = vpop.f32.mrb[2].mxu1 }
 0x424   : > { %v1076_v20 = vmax.f32 %v1070_v22, 0.0  ;;  %v1074_v52 = vpop.f32.mrb[3].mxu1 }
 0x425   : > { %v1077_v26 = vmax.f32 %v1072_v27, 0.0 }
 0x427   : > { %v1080_v38 = vcombine.low %v1076_v20, %v1077_v26 }
 0x429   : > { %1202 = vst.sshfl [vmem:[#allocation3] sm:$0x33 pattern:$0x76325410] %v1080_v38 }
 0x42a PF: > { %p1337_p6 = scmp.eq.s32.totalorder %s1494_s28, 1  ;;  %s1442_s16 = smov [#allocation3]  }
 0x42b   : > { %s1097_s18 = sshll.u32 %s1442_s16, 4  ;;  %s1098_s18 = int_to_ptr.vmem [resolvable:$true] %s1097_s18 }
 0x42c   : > { %s1401_s19 = scalar_lea.vmem %s1098_s18, 64  ;;  %p1408_p10 = scmp.lt.s32.totalorder %s1098_s18, %s1098_s18 }
 0x42d   : > { %p1402_p7 = scmp.ne.s32.totalorder %s1098_s18, %s1401_s19  ;;  %p1409_p11 = scmp.lt.s32.totalorder %s1401_s19, %s1401_s19 }
 0x42f   : > { %p1403_p8 = pnand %p1402_p7, %p1337_p6  ;;  %p1410_p12 = por %p1409_p11, %p1408_p10 }
 0x431   : > { %p1404_p9 = pneg %p1403_p8 }
 0x433   : > { %p1411_p13 = pnand %p1410_p12, %p1404_p9 }
 0x435   : > { %1414 = shalt.err (!%p1411_p13)
}
 0x436   : > { %s1415_s11 = scalar_lea.hbm %s1753_s8, 64 }
 0x437   : > { %p1416_p0 = scmp.ne.s32.totalorder %s1753_s8, %s1415_s11  ;;  %p1421_p3 = scmp.lt.u32.totalorder %s1415_s11, %s1753_s8 }
 0x439   : > { %p1417_p1 = pnand %p1416_p0, %p1337_p6 }
 0x43b   : > { %p1418_p2 = pneg %p1417_p1 }
 0x43d   : > { %p1423_p4 = pnand %p1421_p3, %p1418_p2 }
 0x43f   : > { %1426 = shalt.err (!%p1423_p4)
}
 0x440   : > { %1334 = dma.vmem_to_hbm [thread:$0]  (%p1337_p6), %s1098_s18, 64, %s1753_s8, [#allocation4]  }
 0x441   : > { %1432 = dma.done.wait (%p1337_p6), [#allocation4], 64  }
 0x442   : > { %1434 = vsyncadd (%p1337_p6), [#allocation4], 4294967232 }
 0x443 PF: > { %s19_s27 = sadd.s32 1, %s1437_s27  }
 0x444   : > { %p16_p5 = scmp.ge.s32.totalorder %s19_s27, 4  }
 0x446   :  { %18 = sbr.rel (!%p16_p5) target bundleno = 1 (0x1), region = 93 }
 0x44d   :  { %1110 = vsyncpa [#allocation4], 1 }
 0x44e   :  { %1112 = vsyncpa [#allocation4 + $0x1], 1 }

</bundles_post_ra>
